<compile_context>
chip_gen: v7x
topology: tpu7x:2x2x1
jax: 0.10.0
libtpu: 0.0.40
codegen_flags: <defaults>
</compile_context>

<pallas_src>
import functools

import jax
import jax.numpy as jnp
from jax.experimental import pallas as pl
from jax.experimental.pallas import tpu as pltpu


def _round_up(n, m):
    return ((n + m - 1) // m) * m


def _lognormal_kernel(x_ref, w_ref, b_ref, out_ref, *, o):
    """Fused (mu | sigma) head.

    x_ref   : (TILE_B, I)        streamed per grid step
    w_ref   : (I, N_PAD)         resident (same block every step)
    b_ref   : (1, N_PAD)         resident
    out_ref : (TILE_B, N_PAD)    lanes [0, O) = mu, lanes [O, 2*O) = sigma,
                                 lanes >= 2*O = padding (discarded in wrapper)
    """
    x = x_ref[...]
    # Single MXU matmul covering both heads, f32 accumulation; bias add on VPU.
    fused = jnp.dot(x, w_ref[...], preferred_element_type=jnp.float32) + b_ref[...]
    # Lane mask: columns >= O hold log_var -> sigma = exp(0.5*log_var).
    col = jax.lax.broadcasted_iota(jnp.int32, fused.shape, dimension=1)
    sigma = jnp.exp(0.5 * fused)          # EUP; mu lanes of this are discarded
    out_ref[...] = jnp.where(col >= o, sigma, fused).astype(out_ref.dtype)


def lognormal_forward(x, w_mu, b_mu, w_lv, b_lv, *, tile_b=512):
    """Returns (mu, sigma) — parameters of the LogNormal distribution.

    x     : (..., I)
    w_mu  : (I, O)   (already transposed vs. PyTorch's (O, I) layout)
    b_mu  : (O,)
    w_lv  : (I, O)
    b_lv  : (O,)
    """
    orig_lead = x.shape[:-1]
    I = x.shape[-1]
    O = w_mu.shape[1]
    assert w_mu.shape == (I, O) and w_lv.shape == (I, O)
    assert b_mu.shape == (O,) and b_lv.shape == (O,)

    x2 = x.reshape(-1, I)
    B = x2.shape[0]

    two_o = 2 * O
    n_pad = _round_up(two_o, 128)         # lane-dense output slab width

    # Fuse both heads into one weight / bias (done once in the wrapper; XLA
    # constant-folds this for static params), pad lanes to a 128 multiple.
    w_cat = jnp.concatenate([w_mu, w_lv], axis=1)                  # (I, 2*O)
    b_cat = jnp.concatenate([b_mu, b_lv], axis=0)                  # (2*O,)
    if n_pad != two_o:
        w_cat = jnp.pad(w_cat, ((0, 0), (0, n_pad - two_o)))
        b_cat = jnp.pad(b_cat, (0, n_pad - two_o))
    b_cat = b_cat.reshape(1, n_pad)

    # --- batch tiling -------------------------------------------------------
    # Double-buffered (x tile + out tile) footprint kept under ~8 MiB so the
    # resident weights + pipeline buffers fit the scoped-VMEM default on every
    # chip (v7x has only 64 MiB physical VMEM).
    bytes_per_row = 2 * (I + n_pad) * x2.dtype.itemsize   # x2 = double buffer
    max_tile = max(8, ((8 * 1024 * 1024) // bytes_per_row) // 8 * 8)
    tile_b = min(tile_b, max_tile, _round_up(B, 8))
    tile_b = max(8, (tile_b // 8) * 8)                     # sublane multiple

    b_pad = _round_up(B, tile_b)
    if b_pad != B:
        x2 = jnp.pad(x2, ((0, b_pad - B), (0, 0)))
    grid = (b_pad // tile_b,)

    cost = pl.CostEstimate(
        flops=2 * b_pad * I * n_pad,
        transcendentals=b_pad * n_pad,
        bytes_accessed=(b_pad * I + I * n_pad + n_pad + b_pad * n_pad)
        * x2.dtype.itemsize,
    )

    out = pl.pallas_call(
        functools.partial(_lognormal_kernel, o=O),
        out_shape=jax.ShapeDtypeStruct((b_pad, n_pad), x2.dtype),
        grid=grid,
        in_specs=[
            pl.BlockSpec((tile_b, I), lambda i: (i, 0)),    # x: streamed
            pl.BlockSpec((I, n_pad), lambda i: (0, 0)),     # W_cat: resident
            pl.BlockSpec((1, n_pad), lambda i: (0, 0)),     # b_cat: resident
        ],
        out_specs=pl.BlockSpec((tile_b, n_pad), lambda i: (i, 0)),
        compiler_params=pltpu.CompilerParams(
            dimension_semantics=("parallel",),              # both TCs on v7x
        ),
        cost_estimate=cost,
    )(x2, w_cat, b_cat)

    mu = out[:B, :O].reshape(*orig_lead, O)
    sigma = out[:B, O:two_o].reshape(*orig_lead, O)
    return mu, sigma


if __name__ == "__main__":
    key = jax.random.PRNGKey(0)
    batch, i, o = 8, 32, 16

    k_x, k_wmu, k_bmu, k_wlv, k_blv = jax.random.split(key, 5)

    # Deterministic init mimicking nn.Linear: U(-1/sqrt(i), 1/sqrt(i)).
    bound = 1.0 / (i ** 0.5)
    x = jax.random.normal(k_x, (batch, i), dtype=jnp.float32)
    w_mu = jax.random.uniform(k_wmu, (i, o), jnp.float32, -bound, bound)
    b_mu = jax.random.uniform(k_bmu, (o,), jnp.float32, -bound, bound)
    w_lv = jax.random.uniform(k_wlv, (i, o), jnp.float32, -bound, bound)
    b_lv = jax.random.uniform(k_blv, (o,), jnp.float32, -bound, bound)

    mu, sigma = lognormal_forward(x, w_mu, b_mu, w_lv, b_lv)
    jax.block_until_ready((mu, sigma))

    # Sanity check against plain-JAX reference.
    mu_ref = x @ w_mu + b_mu
    sigma_ref = jnp.exp(0.5 * (x @ w_lv + b_lv))
    assert mu.shape == (batch, o) and sigma.shape == (batch, o)
    assert jnp.allclose(mu, mu_ref, atol=1e-5, rtol=1e-5)
    assert jnp.allclose(sigma, sigma_ref, atol=1e-5, rtol=1e-5)

    print("KERNEL_OK")
</pallas_src>

<mosaic_0001>
module attributes {stable_mosaic.version = 11 : i64} {
  func.func @_lognormal_kernel(%arg0: i32, %arg1: memref<8x32xf32, #tpu.memory_space<vmem>>, %arg2: memref<32x128xf32, #tpu.memory_space<vmem>>, %arg3: memref<1x128xf32, #tpu.memory_space<vmem>>, %arg4: memref<8x128xf32, #tpu.memory_space<vmem>>) attributes {dimension_semantics = [#tpu.dimension_semantics<parallel>], iteration_bounds = array<i64: 1>, scalar_prefetch = 0 : i64, scratch_operands = 0 : i64, tpu.core_type = #tpu.core_type<tc>, window_params = [{transform_indices = @transform_0, window_bounds = array<i64: 8, 32>}, {pipeline_mode = #tpu.pipeline_mode<synchronous>, transform_indices = @transform_1, window_bounds = array<i64: 32, 128>}, {pipeline_mode = #tpu.pipeline_mode<synchronous>, transform_indices = @transform_2, window_bounds = array<i64: 1, 128>}, {transform_indices = @transform_3, window_bounds = array<i64: 8, 128>}]} {
    %c0 = arith.constant 0 : index
    %c0_0 = arith.constant 0 : index
    %0 = vector.load %arg1[%c0, %c0_0] : memref<8x32xf32, #tpu.memory_space<vmem>>, vector<8x32xf32>
    %c0_1 = arith.constant 0 : index
    %c0_2 = arith.constant 0 : index
    %1 = vector.load %arg2[%c0_1, %c0_2] : memref<32x128xf32, #tpu.memory_space<vmem>>, vector<32x128xf32>
    %cst = arith.constant dense<0.000000e+00> : vector<8x128xf32>
    %2 = tpu.matmul %0, %1, %cst {dimension_numbers = #tpu.dot_dimension_numbers<[1], [0], [0], [1], [0, 0, 1, 1], [], []>} : vector<8x32xf32>, vector<32x128xf32>, vector<8x128xf32> -> vector<8x128xf32>
    %c0_3 = arith.constant 0 : index
    %c0_4 = arith.constant 0 : index
    %3 = vector.load %arg3[%c0_3, %c0_4] : memref<1x128xf32, #tpu.memory_space<vmem>>, vector<1x128xf32>
    %4 = vector.broadcast %3 : vector<1x128xf32> to vector<8x128xf32>
    %5 = arith.addf %2, %4 : vector<8x128xf32>
    %6 = tpu.iota {dimensions = array<i32: 1>} : vector<8x128xi32>
    %cst_5 = arith.constant 5.000000e-01 : f32
    %7 = vector.broadcast %cst_5 : f32 to vector<8x128xf32>
    %8 = arith.mulf %7, %5 : vector<8x128xf32>
    %9 = math.exp %8 : vector<8x128xf32>
    %c16_i32 = arith.constant 16 : i32
    %10 = vector.broadcast %c16_i32 : i32 to vector<8x128xi32>
    %11 = arith.cmpi sge, %6, %10 : vector<8x128xi32>
    %12 = arith.select %11, %9, %5 : vector<8x128xi1>, vector<8x128xf32>
    %c0_6 = arith.constant 0 : index
    %c0_7 = arith.constant 0 : index
    %13 = vector.load %arg4[%c0_6, %c0_7] : memref<8x128xf32, #tpu.memory_space<vmem>>, vector<8x128xf32>
    tpu.vector_store %arg4[%c0_6, %c0_7], %12 {strides = array<i32>} : memref<8x128xf32, #tpu.memory_space<vmem>>, vector<8x128xf32>,
    return
  }
  func.func @transform_0(%arg0: i32) -> (i32, i32) {
    %c0_i32 = arith.constant 0 : i32
    %c0_i32_0 = arith.constant 0 : i32
    return %arg0, %c0_i32 : i32, i32
  }
  func.func @transform_1(%arg0: i32) -> (i32, i32) {
    %c0_i32 = arith.constant 0 : i32
    %c0_i32_0 = arith.constant 0 : i32
    %c0_i32_1 = arith.constant 0 : i32
    return %c0_i32, %c0_i32_0 : i32, i32
  }
  func.func @transform_2(%arg0: i32) -> (i32, i32) {
    %c0_i32 = arith.constant 0 : i32
    %c0_i32_0 = arith.constant 0 : i32
    %c0_i32_1 = arith.constant 0 : i32
    return %c0_i32, %c0_i32_0 : i32, i32
  }
  func.func @transform_3(%arg0: i32) -> (i32, i32) {
    %c0_i32 = arith.constant 0 : i32
    %c0_i32_0 = arith.constant 0 : i32
    return %arg0, %c0_i32 : i32, i32
  }
}

</mosaic_0001>

<bundles_post_ra>
// kernel: tpu_custom_call.1
= control target key start
LH: loop header
LB: loop body
LE: loop exit
PB: predicated region body
PF: predicated region fallthrough
CT: control target
= control target key end

     0   :  { %8 = vsyncpa [#allocation3], 0  ;;  %s331_s0 = inlined_call_operand.hbm [shape: f32[8,32], index: 0, kind: input, shape index: {}]   ;;  %s332_s1 = inlined_call_operand.hbm [shape: f32[32,128], index: 1, kind: input, shape index: {}]   ;;  %s333_s2 = inlined_call_operand.vmem [shape: f32[1,128], index: 2, kind: input, shape index: {}]   ;;  %s334_s3 = inlined_call_operand.hbm [shape: f32[8,128], index: 3, kind: output, shape index: {}]  }
   0x1   :  { %9 = vsyncpa [#allocation6], 0 }
   0x2   :  { %10 = vsyncpa [#allocation4], 0  ;;  %s257_s12 = smov [#allocation2]   ;;  %s258_s14 = smov [#allocation5]  }
   0x3   :  { %s17_s13 = sshll.u32 %s257_s12, 4  ;;  %s26_s15 = sshll.u32 %s258_s14, 4  ;;  %s18_s13 = int_to_ptr.vmem [resolvable:$true] %s17_s13  ;;  %s285_s15 = int_to_ptr.vmem [resolvable:$true] %s26_s15 }
   0x4   :  { %s185_s18 = scalar_lea.hbm %s331_s0, 128 }
   0x5   :  { %p186_p0 = scmp.ne.s32.totalorder %s331_s0, %s185_s18  ;;  %p189_p1 = scmp.lt.u32.totalorder %s185_s18, %s331_s0 }
   0x7   :  { %p191_p2 = pnand %p189_p1, %p186_p0 }
   0x9   :  { %194 = shalt.err (!%p191_p2)
}
   0xa   :  { %s195_s23 = scalar_lea.vmem %s18_s13, 128  ;;  %p200_p4 = scmp.lt.s32.totalorder %s18_s13, %s18_s13 }
   0xb   :  { %p196_p3 = scmp.ne.s32.totalorder %s18_s13, %s195_s23  ;;  %p201_p5 = scmp.lt.s32.totalorder %s195_s23, %s195_s23 }
   0xd   :  { %p202_p6 = por %p201_p5, %p200_p4 }
   0xf   :  { %p203_p7 = pnand %p202_p6, %p196_p3 }
  0x11   :  { %206 = shalt.err (!%p203_p7)
}
  0x12   :  { %20 = dma.hbm_to_vmem [thread:$0]  %s331_s0, 128, %s18_s13, [#allocation3]  }
  0x13   :  { %s207_s28 = scalar_lea.hbm %s332_s1, 512 }
  0x14   :  { %p208_p8 = scmp.ne.s32.totalorder %s332_s1, %s207_s28  ;;  %p211_p9 = scmp.lt.u32.totalorder %s207_s28, %s332_s1 }
  0x16   :  { %p213_p10 = pnand %p211_p9, %p208_p8 }
  0x18   :  { %216 = shalt.err (!%p213_p10)
}
  0x19   :  { %s217_s6 = scalar_lea.vmem %s285_s15, 512  ;;  %p222_p12 = scmp.lt.s32.totalorder %s285_s15, %s285_s15 }
  0x1a   :  { %p218_p11 = scmp.ne.s32.totalorder %s285_s15, %s217_s6  ;;  %p223_p13 = scmp.lt.s32.totalorder %s217_s6, %s217_s6 }
  0x1c   :  { %p224_p0 = por %p223_p13, %p222_p12 }
  0x1e   :  { %p225_p1 = pnand %p224_p0, %p218_p11 }
  0x20   :  { %228 = shalt.err (!%p225_p1)
}
  0x21   :  { %s259_s0 = smov 128   ;;  %s260_s7 = smov 8  }
  0x22   :  { %32 = dma.hbm_to_vmem [thread:$0]  %s332_s1, 512, %s285_s15, [#allocation6], %s259_s0, %s259_s0, %s260_s7  }
  0x23   :  { %251 = dma.done.wait [#allocation3], 128  }
  0x24   :  { %252 = vsyncadd [#allocation3], 4294967168 }
  0x25   :  { %253 = dma.done.wait [#allocation6], 512  }
  0x26   :  { %254 = vsyncadd [#allocation6], 4294966784  ;;  %v261_v0 = vmov 0.0|0.0   ;;  %vm262_vm0 = vmmov 0   ;;  %v263_v1 = vmov 0.0   ;;  %v42_v2 = vld [vmem:[#allocation5] sm:$0xff]  ;;  %v127_v15 = vlaneseq }
  0x27   :  { %169 = vmatprep.subr.bf16.mxu0 %v261_v0  ;;  %166 = vmatprep.mubr.msk.f32.mxu0 %vm262_vm0, %v263_v1  ;;  %v43_v3 = vld [vmem:[#allocation5 + $0x8] sm:$0xff]  ;;  %v44_v4 = vld [vmem:[#allocation5 + $0x10] sm:$0xff]  ;;  %v45_v6 = vld [vmem:[#allocation5 + $0x18] sm:$0xff]  ;;  %vm53_vm1 = vcmask 261120   ;;  %s264_s11 = smov [#allocation7]  }
  0x28   :  { %v170_v5 = vpack.c.bf16 %v43_v3, %v42_v2  ;;  %v173_v7 = vpack.c.bf16 %v45_v6, %v44_v4  ;;  %v41_v8 = vld [vmem:[#allocation2] sm:$0xff]  ;;  %v128_v16 = vand.u32 127, %v127_v15  ;;  %s141_s12 = sshll.u32 %s264_s11, 4  ;;  %s142_s12 = int_to_ptr.vmem [resolvable:$true] %s141_s12 }
  0x29   :  { %v151_v9 = vld [vmem:[%s333_s2] ss:$0 sm:$0xff]  ;;  %s229_s13 = scalar_lea.vmem %s142_s12, 128  ;;  %p234_p3 = scmp.lt.s32.totalorder %s142_s12, %s142_s12 }
  0x2a   :  { %171 = vmatpush3.bf16.msra.mxu0 %v170_v5  ;;  %vm132_vm2 = vcmp.ge.s32.totalorder %v128_v16, 16  ;;  %p230_p2 = scmp.ne.s32.totalorder %s142_s12, %s229_s13  ;;  %p235_p4 = scmp.lt.s32.totalorder %s229_s13, %s229_s13 }
  0x2b   :  { %172 = vmatprep.subr.bf16.mxu0 %v261_v0 }
  0x2c   :  { %p236_p5 = por %p235_p4, %p234_p3 }
  0x2e   :  { %174 = vmatpush3.bf16.msra.mxu0 %v173_v7  ;;  %p237_p6 = pnand %p236_p5, %p230_p2 }
  0x31   :  { %167 = vmatmul.mubr.msk.f32.vlgmr.msra.gmra.mrb[0].mxu0 %vm53_vm1, %v41_v8 }
 0x104   :  { %v123_v10 = vpop.f32.mrb[0].mxu0 }
 0x105   :  { %v124_v11 = vadd.f32 %v151_v9, %v123_v10  ;;  %v168_v12 = vpop.f32.mrb[1].mxu0 }
 0x107   :  { %v129_v13 = vmul.f32 0.5, %v124_v11 }
 0x109   :  { %v130_v14 = vmul.f32 1.442695, %v129_v13 }
 0x10b   :  { %183 = vpow2.f32 %v130_v14 }
 0x115   :  { %v184_v17 = vpop.eup %183 }
 0x116   :  { %v133_v18 = vsel %vm132_vm2, %v184_v17, %v124_v11 }
 0x117   :  { %134 = vst [vmem:[#allocation7] sm:$0xff] %v133_v18 }
 0x118   :  { %240 = shalt.err (!%p237_p6)
}
 0x119   :  { %s241_s15 = scalar_lea.hbm %s334_s3, 128 }
 0x11a   :  { %p242_p7 = scmp.ne.s32.totalorder %s334_s3, %s241_s15  ;;  %p245_p8 = scmp.lt.u32.totalorder %s241_s15, %s334_s3 }
 0x11c   :  { %p247_p9 = pnand %p245_p8, %p242_p7 }
 0x11e   :  { %250 = shalt.err (!%p247_p9)
}
 0x11f   :  { %144 = dma.vmem_to_hbm [thread:$0]  %s142_s12, 128, %s334_s3, [#allocation4]  }
 0x120   :  { %255 = dma.done.wait [#allocation4], 128  }
 0x121   :  { %256 = vsyncadd [#allocation4], 4294967168 }
 0x122   :  { %148 = vsyncpa [#allocation3], 1 }
 0x123   :  { %149 = vsyncpa [#allocation6], 1 }
 0x124   :  { %150 = vsyncpa [#allocation4], 1 }

</bundles_post_ra>
